<compile_context>
chip_gen: v7x
topology: tpu7x:2x2x1
jax: 0.10.0
libtpu: 0.0.40
codegen_flags: <defaults>
</compile_context>

<pallas_src>
import jax
import jax.numpy as jnp
from jax.experimental import pallas as pl
from jax.experimental.pallas import tpu as pltpu


def _gru_candidate_kernel(wu_ref, b_ref, x_ref, r_ref, o_ref):
    # wu_ref : (2*C_out, C_in)   [W ; U] stacked, PyTorch (out, in) layout
    # b_ref  : (2*C_out, 1)      [b_w ; b_u] stacked (float32)
    # x_ref  : (1, C_in,  TP)    channels x pixels for one batch / pixel tile
    # r_ref  : (1, C_out, TP)
    # o_ref  : (1, C_out, TP)
    c_out = o_ref.shape[1]

    x = x_ref[0]                                   # (C_in, TP)
    # Single fused MXU matmul: (2*C_out, C_in) @ (C_in, TP) -> (2*C_out, TP)
    acc = jnp.dot(wu_ref[...], x, preferred_element_type=jnp.float32)
    acc = acc + b_ref[...]                         # (2*C_out, 1) broadcast over lanes

    wx = acc[:c_out]                               # (C_out, TP)  sublane-aligned split
    ux = acc[c_out:]                               # (C_out, TP)
    r = r_ref[0].astype(jnp.float32)               # (C_out, TP)

    o_ref[0] = jnp.tanh(wx + r * ux).astype(o_ref.dtype)


def gru_candidate(x_nchw, r_nchw, w_conv, b_w, u_conv, b_u, tile_pixels=2048):
    """x_nchw: (N, C_in, H, W), r_nchw: (N, C_out, H, W).
    w_conv/u_conv: (C_out, C_in, 1, 1) PyTorch Conv2d weight layout."""
    N, C_in, H, W = x_nchw.shape
    C_out = w_conv.shape[0]
    HW = H * W

    # Pixel tile: either the whole spatial extent, or a 128-multiple chunk.
    if HW <= tile_pixels:
        TP = HW
    else:
        TP = tile_pixels  # multiple of 128 by construction
    grid_p = pl.cdiv(HW, TP)

    # Pure reshapes (no transposes, no extra HBM passes).
    x3 = x_nchw.reshape(N, C_in, HW)
    r3 = r_nchw.reshape(N, C_out, HW)

    # Fused weights / biases: [W ; U] -> (2*C_out, C_in), [b_w ; b_u] -> (2*C_out, 1).
    wu = jnp.concatenate(
        [w_conv.reshape(C_out, C_in), u_conv.reshape(C_out, C_in)], axis=0)
    bwu = jnp.concatenate([b_w, b_u]).reshape(2 * C_out, 1).astype(jnp.float32)

    out3 = pl.pallas_call(
        _gru_candidate_kernel,
        out_shape=jax.ShapeDtypeStruct((N, C_out, HW), x_nchw.dtype),
        grid=(N, grid_p),
        in_specs=[
            # Grid-resident constants (index map always (0, 0)).
            pl.BlockSpec((2 * C_out, C_in), lambda n, p: (0, 0)),
            pl.BlockSpec((2 * C_out, 1), lambda n, p: (0, 0)),
            # Streaming, lane-dense tiles.
            pl.BlockSpec((1, C_in, TP), lambda n, p: (n, 0, p)),
            pl.BlockSpec((1, C_out, TP), lambda n, p: (n, 0, p)),
        ],
        out_specs=pl.BlockSpec((1, C_out, TP), lambda n, p: (n, 0, p)),
        compiler_params=pltpu.CompilerParams(
            dimension_semantics=("parallel", "parallel")),
    )(wu, bwu, x3, r3)

    return out3.reshape(N, C_out, H, W)


def _reference(x, r, w_conv, b_w, u_conv, b_u):
    """Pure-JAX reference of the PyTorch forward (1x1 convs)."""
    wx = jnp.einsum("nchw,oc->nohw", x, w_conv[:, :, 0, 0]) + b_w[None, :, None, None]
    ux = jnp.einsum("nchw,oc->nohw", x, u_conv[:, :, 0, 0]) + b_u[None, :, None, None]
    return jnp.tanh(wx + r * ux)


if __name__ == "__main__":
    N, C_in, C_out, H, W = 2, 4, 8, 16, 16

    key = jax.random.PRNGKey(0)
    k_x, k_r, k_w, k_bw, k_u, k_bu = jax.random.split(key, 6)

    x = jax.random.normal(k_x, (N, C_in, H, W), dtype=jnp.float32)
    r = jax.random.uniform(k_r, (N, C_out, H, W), dtype=jnp.float32)

    # PyTorch Conv2d weight layout: (C_out, C_in, 1, 1)
    w_conv = jax.random.normal(k_w, (C_out, C_in, 1, 1), dtype=jnp.float32) * 0.1
    b_w = jax.random.normal(k_bw, (C_out,), dtype=jnp.float32) * 0.1
    u_conv = jax.random.normal(k_u, (C_out, C_in, 1, 1), dtype=jnp.float32) * 0.1
    b_u = jax.random.normal(k_bu, (C_out,), dtype=jnp.float32) * 0.1

    out = gru_candidate(x, r, w_conv, b_w, u_conv, b_u)
    out = jax.block_until_ready(out)

    ref = _reference(x, r, w_conv, b_w, u_conv, b_u)
    assert out.shape == (N, C_out, H, W)
    assert jnp.allclose(out, ref, atol=1e-5, rtol=1e-5)

    print("KERNEL_OK")
</pallas_src>

<mosaic_0001>
module attributes {stable_mosaic.version = 11 : i64} {
  func.func @_gru_candidate_kernel(%arg0: i32, %arg1: i32, %arg2: memref<16x4xf32, #tpu.memory_space<vmem>>, %arg3: memref<16x1xf32, #tpu.memory_space<vmem>>, %arg4: memref<1x4x256xf32, #tpu.memory_space<vmem>>, %arg5: memref<1x8x256xf32, #tpu.memory_space<vmem>>, %arg6: memref<1x8x256xf32, #tpu.memory_space<vmem>>) attributes {dimension_semantics = [#tpu.dimension_semantics<parallel>, #tpu.dimension_semantics<parallel>], iteration_bounds = array<i64: 2, 1>, scalar_prefetch = 0 : i64, scratch_operands = 0 : i64, tpu.core_type = #tpu.core_type<tc>, window_params = [{pipeline_mode = #tpu.pipeline_mode<synchronous>, transform_indices = @transform_0, window_bounds = array<i64: 16, 4>}, {pipeline_mode = #tpu.pipeline_mode<synchronous>, transform_indices = @transform_1, window_bounds = array<i64: 16, 1>}, {transform_indices = @transform_2, window_bounds = array<i64: 1, 4, 256>}, {transform_indices = @transform_3, window_bounds = array<i64: 1, 8, 256>}, {transform_indices = @transform_4, window_bounds = array<i64: 1, 8, 256>}]} {
    %c0 = arith.constant 0 : index
    %c0_0 = arith.constant 0 : index
    %c0_1 = arith.constant 0 : index
    %0 = vector.load %arg4[%c0, %c0_0, %c0_1] : memref<1x4x256xf32, #tpu.memory_space<vmem>>, vector<1x4x256xf32>
    %1 = vector.shape_cast %0 : vector<1x4x256xf32> to vector<4x256xf32>
    %c0_2 = arith.constant 0 : index
    %c0_3 = arith.constant 0 : index
    %2 = vector.load %arg2[%c0_2, %c0_3] : memref<16x4xf32, #tpu.memory_space<vmem>>, vector<16x4xf32>
    %cst = arith.constant dense<0.000000e+00> : vector<16x256xf32>
    %3 = tpu.matmul %2, %1, %cst {dimension_numbers = #tpu.dot_dimension_numbers<[1], [0], [0], [1], [0, 0, 1, 1], [], []>} : vector<16x4xf32>, vector<4x256xf32>, vector<16x256xf32> -> vector<16x256xf32>
    %c0_4 = arith.constant 0 : index
    %c0_5 = arith.constant 0 : index
    %4 = vector.load %arg3[%c0_4, %c0_5] : memref<16x1xf32, #tpu.memory_space<vmem>>, vector<16x1xf32>
    %5 = vector.broadcast %4 : vector<16x1xf32> to vector<16x256xf32>
    %6 = arith.addf %3, %5 : vector<16x256xf32>
    %7 = vector.extract_strided_slice %6 {offsets = [0, 0], sizes = [8, 256], strides = [1, 1]} : vector<16x256xf32> to vector<8x256xf32>
    %8 = vector.extract_strided_slice %6 {offsets = [8, 0], sizes = [8, 256], strides = [1, 1]} : vector<16x256xf32> to vector<8x256xf32>
    %c0_6 = arith.constant 0 : index
    %c0_7 = arith.constant 0 : index
    %c0_8 = arith.constant 0 : index
    %9 = vector.load %arg5[%c0_6, %c0_7, %c0_8] : memref<1x8x256xf32, #tpu.memory_space<vmem>>, vector<1x8x256xf32>
    %10 = vector.shape_cast %9 : vector<1x8x256xf32> to vector<8x256xf32>
    %11 = arith.mulf %10, %8 : vector<8x256xf32>
    %12 = arith.addf %7, %11 : vector<8x256xf32>
    %13 = math.tanh %12 : vector<8x256xf32>
    %c0_9 = arith.constant 0 : index
    %c0_10 = arith.constant 0 : index
    %c0_11 = arith.constant 0 : index
    %14 = vector.load %arg6[%c0_9, %c0_10, %c0_11] : memref<1x8x256xf32, #tpu.memory_space<vmem>>, vector<1x8x256xf32>
    %15 = vector.shape_cast %14 : vector<1x8x256xf32> to vector<8x256xf32>
    %16 = vector.shape_cast %13 : vector<8x256xf32> to vector<1x8x256xf32>
    tpu.vector_store %arg6[%c0_9, %c0_10, %c0_11], %16 {strides = array<i32>} : memref<1x8x256xf32, #tpu.memory_space<vmem>>, vector<1x8x256xf32>,
    return
  }
  func.func @transform_0(%arg0: i32, %arg1: i32) -> (i32, i32) {
    %c0_i32 = arith.constant 0 : i32
    %c0_i32_0 = arith.constant 0 : i32
    %c0_i32_1 = arith.constant 0 : i32
    return %c0_i32, %c0_i32_0 : i32, i32
  }
  func.func @transform_1(%arg0: i32, %arg1: i32) -> (i32, i32) {
    %c0_i32 = arith.constant 0 : i32
    %c0_i32_0 = arith.constant 0 : i32
    %c0_i32_1 = arith.constant 0 : i32
    return %c0_i32, %c0_i32_0 : i32, i32
  }
  func.func @transform_2(%arg0: i32, %arg1: i32) -> (i32, i32, i32) {
    %c0_i32 = arith.constant 0 : i32
    %c0_i32_0 = arith.constant 0 : i32
    return %arg0, %c0_i32, %arg1 : i32, i32, i32
  }
  func.func @transform_3(%arg0: i32, %arg1: i32) -> (i32, i32, i32) {
    %c0_i32 = arith.constant 0 : i32
    %c0_i32_0 = arith.constant 0 : i32
    return %arg0, %c0_i32, %arg1 : i32, i32, i32
  }
  func.func @transform_4(%arg0: i32, %arg1: i32) -> (i32, i32, i32) {
    %c0_i32 = arith.constant 0 : i32
    %c0_i32_0 = arith.constant 0 : i32
    return %arg0, %c0_i32, %arg1 : i32, i32, i32
  }
}

</mosaic_0001>

<bundles_post_ra>
// kernel: tpu_custom_call.1
= control target key start
LH: loop header
LB: loop body
LE: loop exit
PB: predicated region body
PF: predicated region fallthrough
CT: control target
= control target key end

     0   :  { %9 = vsyncpa [#allocation3], 0  ;;  %s812_s0 = inlined_call_operand.vmem [shape: f32[16,4], index: 0, kind: input, shape index: {}]   ;;  %s813_s1 = inlined_call_operand.vmem [shape: f32[16,1], index: 1, kind: input, shape index: {}]   ;;  %s814_s2 = inlined_call_operand.vmem [shape: f32[2,4,256], index: 2, kind: input, shape index: {}]   ;;  %s815_s3 = inlined_call_operand.vmem [shape: f32[2,8,256], index: 3, kind: input, shape index: {}]   ;;  %s816_s4 = inlined_call_operand.hbm [shape: f32[2,8,256], index: 4, kind: output, shape index: {}]  }
   0x1   :  { %11 = vsyncpa [#allocation3 + $0x1], 0  ;;  %s685_s15 = smov 0   ;;  %s687_s16 = smov 0  }
   0x2   :  { %s689_s17 = smov 0   ;;  %s691_s18 = smov 0  }
   0x3   :  { %s693_s19 = smov 0   ;;  %s695_s20 = smov 0  }
   0x4 LB: > { %s490_s21 = sadd.s32 4294967295, %s655_s20   ;;  %s491_s22 = sadd.s32 4294967294, %s655_s20   ;;  %s655_s20 = sphi %s695_s20, %s17_s20   ;;  %s651_s19 = sphi %s693_s19, %s823_s19   ;;  %s647_s18 = sphi %s691_s18, %s822_s18   ;;  %s643_s17 = sphi %s689_s17, %s821_s17   ;;  %s639_s16 = sphi %s687_s16, %s820_s16   ;;  %s635_s15 = sphi %s685_s15, %s819_s15  }
   0x5   : > { %s29_s23 = sadd.s32 1, %s651_s19  ;;  %s136_s24 = sadd.s32 1, %s643_s17 }
   0x6   : > { %p31_p0 = scmp.ge.s32.totalorder %s29_s23, 2  ;;  %p146_p1 = scmp.ne.s32.totalorder %s643_s17, %s639_s16 }
   0x7   : > { %p147_p2 = scmp.eq.s32.totalorder %s490_s21, 1  ;;  %p152_p3 = scmp.ne.s32.totalorder %s639_s16, %s635_s15 }
   0x8   : > { %s825_s23 = smov (%p31_p0, %s29_s23), 0  ;;  %p153_p5 = scmp.eq.s32.totalorder %s491_s22, 1 }
   0x9   : > { %p725_p4 = por %p147_p2, %p146_p1  ;;  %s131_s26 = ssub.s32 %s651_s19, %s825_s23 }
   0xa   : > { %p494_p6 = scmp.ge.s32.totalorder %s655_s20, 1  ;;  %p134_p7 = scmp.eq.s32.totalorder %s131_s26, 0 }
   0xb   : > { %p732_p8 = por %p153_p5, %p152_p3  ;;  %p203_p9 = scmp.lt.s32.totalorder %s655_s20, 3 }
   0xc   : > { %s738_s28 = scalar_select %p134_p7, %s643_s17, %s136_s24  }
   0xd   : > { %p204_p10 = pnand %p494_p6, %p203_p9 }
   0xe   : > { %p243_p11 = scmp.lt.s32.totalorder (!%p204_p10), %s647_s18, 1  ;;  %v657_v0 = vmov (!%p204_p10), 0.0   ;;  %v267_v1 = vld [vmem:[%s813_s1 + $0x8] sm:$0xff] (!%p204_p10)  ;;  %v658_v2 = vmov (!%p204_p10), 0   ;;  %v266_v3 = vld [vmem:[%s813_s1] sm:$0xff] (!%p204_p10)  ;;  %vm287_vm0 = vcmask (!%p204_p10), 1043456  }
   0xf   : > { %207 = sbr.rel (%p204_p10) target bundleno = 275 (0x113), region = 36  ;;  %356 = vmatprep.mubr.f32.mxu0 (!%p204_p10), %v657_v0  ;;  %362 = vmatprep.mubr.f32.mxu1 (!%p204_p10), %v657_v0  ;;  %v264_v6 = vld [vmem:[%s812_s0] sm:$0xff] (!%p204_p10)  ;;  %vm280_vm1 = vcmask (!%p204_p10), 31744   ;;  %v265_v7 = vld [vmem:[%s812_s0 + $0x8] sm:$0xff] (!%p204_p10)  ;;  %s239_s30 = sand.u32 (!%p204_p10), 1, %s639_s16  }
  0x10   : > { %571 = vset.pattern.permute.xlu0 (!%p204_p10), %v658_v2  ;;  %s380_s12 = scalar_lea.sflag (!%p204_p10), [#allocation3], %s239_s30 }
  0x11   : > { %275 = vperm.xlu0 (!%p204_p10), %571, %v267_v1  }
  0x15   : > { %270 = vperm.xlu0 (!%p204_p10), %571, %v266_v3  }
  0x16   : > { %s244_s5 = scalar_select %p243_p11, %s647_s18, 1 }
  0x18   : > { %s509_s6 = sshll.u32 %s244_s5, 3  ;;  %s510_s22 = sshll.u32 %s244_s5, 4 }
  0x19   : > { %s250_s11 = scalar_lea.vmem %s814_s2, %s509_s6  ;;  %s260_s29 = scalar_lea.vmem %s815_s3, %s510_s22 }
  0x1a   : > { %v263_v4 = vld [vmem:[%s250_s11] sm:$0xff]  ;;  %v370_v16 = vld [vmem:[%s260_s29 + $0x8] sm:$0xff]  ;;  %s495_s5 = sshll.u32 %s239_s30, 4  ;;  %s511_s6 = sshll.u32 %s647_s18, 8 }
  0x1b   : > { %v279_v5 = vcombine.high %v263_v4, %v263_v4  ;;  %v369_v12 = vld [vmem:[%s260_s29] sm:$0xff]  ;;  %s241_s7 = scalar_lea.vmem [#allocation2], %s495_s5  ;;  %s765_s11 = scalar_lea.hbm %s816_s4, %s511_s6 }
  0x1c   : > { %s396_s8 = sshll.u32 %s241_s7, 4  ;;  %s659_s18 = smov [#allocation2]   ;;  %s767_s8 = int_to_ptr.vmem [resolvable:$true] %s396_s8 }
  0x1d   : > { %500 = vmatprep.subr.msk.mxu0 %vm287_vm0, %v279_v5  ;;  %512 = vmatprep.subr.msk.mxu1 %vm287_vm0, %v279_v5  ;;  %s577_s13 = scalar_lea.vmem %s767_s8, 256  ;;  %s581_s14 = sshll.u32 %s659_s18, 4  ;;  %s582_s14 = int_to_ptr.vmem [resolvable:$false] %s581_s14 }
  0x1e   : > { %501 = vmatpush1.msk.msra.mxu0 %vm287_vm0, %v263_v4  ;;  %513 = vmatpush1.msk.msra.mxu1 %vm287_vm0, %v263_v4  ;;  %p578_p12 = scmp.ne.s32.totalorder %s767_s8, %s577_s13  ;;  %s583_s21 = scalar_lea.vmem %s582_s14, 512 }
  0x1f   : > { %502 = vmatmul.mubr.msk.f32.vlgmr.msra.gmra.mrb[0].mxu0 %vm280_vm1, %v264_v6  ;;  %503 = vmatmul.mubr.msk.f32.vlgmr.msra.gmra.mrb[0].mxu1 %vm280_vm1, %v265_v7  ;;  %p584_p1 = scmp.lt.s32.totalorder %s767_s8, %s582_s14  ;;  %p585_p2 = scmp.lt.s32.totalorder %s583_s21, %s577_s13 }
  0x20   : > { %p579_p13 = pnand %p578_p12, %p725_p4 }
  0x21   : > { %p586_p3 = por %p585_p2, %p584_p1 }
  0x22   : > { %p580_p0 = pneg %p579_p13 }
  0x24   : > { %p587_p5 = pnand %p586_p3, %p580_p0 }
  0x90   : > { %v276_v8 = vpop.permute.xlu0 %275 }
  0x94   : > { %v271_v9 = vpop.permute.xlu0 %270 }
  0xf2   : > { %v358_v10 = vpop.f32.mrb[0].mxu0  ;;  %v364_v11 = vpop.f32.mrb[0].mxu1 }
  0xf3   : > { %v365_v13 = vadd.f32 %v364_v11, %v276_v8  ;;  %v360_v14 = vpop.f32.mrb[1].mxu0  ;;  %v366_v15 = vpop.f32.mrb[1].mxu1  ;;  %v359_v18 = vadd.f32 %v358_v10, %v271_v9 }
  0xf4   : > { %v367_v17 = vadd.f32 %v366_v15, %v276_v8  ;;  %v361_v20 = vadd.f32 %v360_v14, %v271_v9 }
  0xf5   : > { %v371_v19 = vmul.f32 %v369_v12, %v365_v13 }
  0xf6   : > { %v372_v21 = vmul.f32 %v370_v16, %v367_v17 }
  0xf7   : > { %v373_v22 = vadd.f32 %v371_v19, %v359_v18 }
  0xf8   : > { %v374_v23 = vadd.f32 %v372_v21, %v361_v20 }
  0xf9   : > { %573 = vtanh.f32 %v373_v22 }
  0xfa   : > { %575 = vtanh.f32 %v374_v23 }
 0x103   : > { %v574_v24 = vpop.eup %573 }
 0x104   : > { %v576_v25 = vpop.eup %575  ;;  %377 = vst [vmem:[%s241_s7] sm:$0xff] %v574_v24 }
 0x105   : > { %378 = vst [vmem:[%s241_s7 + $0x8] sm:$0xff] %v576_v25 }
 0x106   : > { %590 = shalt.err (!%p587_p5)
}
 0x107   : > { %s591_s22 = scalar_lea.hbm %s765_s11, 256  ;;  %s595_s29 = scalar_lea.hbm %s816_s4, 512 }
 0x108   : > { %p592_p6 = scmp.ne.s32.totalorder %s765_s11, %s591_s22  ;;  %p596_p10 = scmp.lt.u32.totalorder %s765_s11, %s816_s4 }
 0x109   : > { %p597_p11 = scmp.lt.u32.totalorder %s595_s29, %s591_s22  ;;  %p599_p13 = scmp.lt.u32.totalorder %s591_s22, %s765_s11 }
 0x10a   : > { %p593_p7 = pnand %p592_p6, %p725_p4 }
 0x10b   : > { %p598_p12 = por %p597_p11, %p596_p10 }
 0x10c   : > { %p594_p9 = pneg %p593_p7 }
 0x10d   : > { %p600_p0 = por %p599_p13, %p598_p12 }
 0x10f   : > { %p601_p1 = pnand %p600_p0, %p594_p9 }
 0x111   : > { %604 = shalt.err (!%p601_p1)
}
 0x112   : > { %514 = dma.vmem_to_hbm [thread:$0]  (%p725_p4), %s767_s8, 256, %s765_s11, %s380_s12  }
 0x113 PF: > { %p520_p2 = scmp.ge.s32.totalorder %s655_s20, 2  ;;  %s408_s6 = sand.u32 1, %s635_s15  }
 0x114   : > { %s409_s7 = scalar_lea.sflag [#allocation3], %s408_s6 }
 0x115   : > { %p517_p3 = pnand %p520_p2, %p732_p8 }
 0x117   : > { %630 = dma.done.wait (!%p517_p3), %s409_s7, 256  }
 0x118   : > { %632 = vsyncadd (!%p517_p3), %s409_s7, 4294967040  ;;  %s17_s20 = sadd.s32 1, %s655_s20   ;;  %s819_s15 = smov %s639_s16 }
 0x119   : > { %p14_p5 = scmp.ge.s32.totalorder %s17_s20, 4   ;;  %s820_s16 = smov %s643_s17 }
 0x11a   : > { %s821_s17 = smov %s738_s28  ;;  %s822_s18 = smov %s651_s19 }
 0x11b   : > { %s823_s19 = smov %s825_s23  ;;  %16 = sbr.rel (!%p14_p5) target bundleno = 4 (0x4), region = 74 }
 0x122   :  { %414 = vsyncpa [#allocation3], 1 }
 0x123   :  { %416 = vsyncpa [#allocation3 + $0x1], 1 }

</bundles_post_ra>
